<compile_context>
chip_gen: v7x
topology: tpu7x:2x2x1
jax: 0.10.0
libtpu: 0.0.40
codegen_flags: <defaults>
</compile_context>

<pallas_src>
import functools

import jax
import jax.numpy as jnp
from jax.experimental import pallas as pl
from jax.experimental.pallas import tpu as pltpu


def _label_smoothing_kernel(pred_ref, tgt_ref, out_ref, *,
                            confidence, off_value, total_n):
    tile_n, num_classes = pred_ref.shape

    x = pred_ref[...].astype(jnp.float32)                       # (TN, C)

    # Numerically stable log-softmax pieces.
    m = jnp.max(x, axis=-1, keepdims=True)                      # (TN, 1)
    z = x - m                                                   # (TN, C)
    lse = jnp.log(jnp.sum(jnp.exp(z), axis=-1, keepdims=True))  # (TN, 1)

    # sum_c logp = sum_c z - C * lse
    sum_z = jnp.sum(z, axis=-1, keepdims=True)                  # (TN, 1)
    sum_logp = sum_z - jnp.float32(num_classes) * lse           # (TN, 1)

    # logp[target] = z[target] - lse  (single masked select + reduce)
    cls_ids = jax.lax.broadcasted_iota(jnp.int32, (tile_n, num_classes), 1)
    tgt = tgt_ref[...]                                          # (TN, 1) int32
    z_t = jnp.sum(jnp.where(cls_ids == tgt, z, 0.0), axis=-1, keepdims=True)
    logp_t = z_t - lse                                          # (TN, 1)

    # Per-row loss: -(off * sum_c logp + (confidence - off) * logp[target])
    row_loss = -(jnp.float32(off_value) * sum_logp +
                 jnp.float32(confidence - off_value) * logp_t)  # (TN, 1)

    # Zero out padded rows (global row index >= total_n).
    rows = (pl.program_id(0) * tile_n +
            jax.lax.broadcasted_iota(jnp.int32, (tile_n, 1), 0))
    row_loss = jnp.where(rows < total_n, row_loss, 0.0)

    out_ref[...] = row_loss


def _pick_tile_n(n, c, itemsize, budget_bytes=4 * 1024 * 1024):
    """Largest multiple-of-8 row tile whose pred block stays under budget_bytes."""
    t = budget_bytes // max(1, c * itemsize)
    t = max(8, min(1024, t))
    t = (t // 8) * 8
    n_rounded = ((n + 7) // 8) * 8
    return min(t, n_rounded)


def label_smoothing_loss(pred, target, *, smoothing=0.1, tile_n=None):
    """pred: (N, C) float32/bfloat16, target: (N,) int. Returns scalar f32 loss."""
    N, C = pred.shape
    confidence = 1.0 - smoothing
    off_value = smoothing / (C - 1)

    if tile_n is None:
        tile_n = _pick_tile_n(N, C, jnp.dtype(pred.dtype).itemsize)
    assert tile_n % 8 == 0 and tile_n > 0

    n_pad = ((N + tile_n - 1) // tile_n) * tile_n

    tgt2d = target.astype(jnp.int32).reshape(N, 1)
    if n_pad != N:
        pred = jnp.pad(pred, ((0, n_pad - N), (0, 0)))
        tgt2d = jnp.pad(tgt2d, ((0, n_pad - N), (0, 0)))

    kernel = functools.partial(
        _label_smoothing_kernel,
        confidence=confidence,
        off_value=off_value,
        total_n=N,
    )

    row_losses = pl.pallas_call(
        kernel,
        out_shape=jax.ShapeDtypeStruct((n_pad, 1), jnp.float32),
        grid_spec=pltpu.PrefetchScalarGridSpec(
            num_scalar_prefetch=0,
            grid=(n_pad // tile_n,),
            in_specs=[
                pl.BlockSpec((tile_n, C), lambda i: (i, 0)),
                pl.BlockSpec((tile_n, 1), lambda i: (i, 0)),
            ],
            out_specs=pl.BlockSpec((tile_n, 1), lambda i: (i, 0)),
        ),
        compiler_params=pltpu.CompilerParams(
            dimension_semantics=("parallel",)),
    )(pred, tgt2d)

    # Tiny final reduction in plain JAX (padded rows were zeroed in-kernel).
    return jnp.sum(row_losses) / jnp.float32(N)


def _reference(pred, target, smoothing):
    # Pure-JAX reference mirroring the PyTorch module.
    C = pred.shape[-1]
    confidence = 1.0 - smoothing
    logp = jax.nn.log_softmax(pred.astype(jnp.float32), axis=-1)
    true_dist = jnp.full_like(logp, smoothing / (C - 1))
    true_dist = true_dist.at[jnp.arange(pred.shape[0]), target].set(confidence)
    return jnp.mean(jnp.sum(-true_dist * logp, axis=-1))


if __name__ == "__main__":
    key = jax.random.PRNGKey(0)
    k1, k2, k3, k4 = jax.random.split(key, 4)
    smoothing = 0.1

    # Case 1: small f32 case (matches the module's typical (batch, classes) use).
    batch, classes = 16, 32
    pred = jax.random.normal(k1, (batch, classes), dtype=jnp.float32)
    target = jax.random.randint(k2, (batch,), 0, classes, dtype=jnp.int32)
    loss = jax.block_until_ready(label_smoothing_loss(pred, target, smoothing=smoothing))
    ref = _reference(pred, target, smoothing)
    assert jnp.allclose(loss, ref, rtol=1e-5, atol=1e-5), (loss, ref)

    # Case 2: batch not a multiple of the tile (exercises padding + row masking).
    batch2, classes2 = 13, 40
    pred2 = jax.random.normal(k3, (batch2, classes2), dtype=jnp.float32)
    target2 = jax.random.randint(k4, (batch2,), 0, classes2, dtype=jnp.int32)
    loss2 = jax.block_until_ready(label_smoothing_loss(pred2, target2, smoothing=smoothing))
    ref2 = _reference(pred2, target2, smoothing)
    assert jnp.allclose(loss2, ref2, rtol=1e-5, atol=1e-5), (loss2, ref2)

    # Case 3: bf16 logits in HBM (half the HBM traffic; f32 math in-kernel).
    pred_bf16 = pred.astype(jnp.bfloat16)
    loss3 = jax.block_until_ready(label_smoothing_loss(pred_bf16, target, smoothing=smoothing))
    ref3 = _reference(pred_bf16.astype(jnp.float32), target, smoothing)
    assert jnp.allclose(loss3, ref3, rtol=1e-5, atol=1e-5), (loss3, ref3)

    print("KERNEL_OK")
</pallas_src>

<mosaic_0001>
module attributes {stable_mosaic.version = 11 : i64} {
  func.func @_label_smoothing_kernel(%arg0: i32, %arg1: memref<16x32xf32, #tpu.memory_space<vmem>>, %arg2: memref<16x1xi32, #tpu.memory_space<vmem>>, %arg3: memref<16x1xf32, #tpu.memory_space<vmem>>) attributes {dimension_semantics = [#tpu.dimension_semantics<parallel>], iteration_bounds = array<i64: 1>, scalar_prefetch = 0 : i64, scratch_operands = 0 : i64, tpu.core_type = #tpu.core_type<tc>, window_params = [{transform_indices = @transform_0, window_bounds = array<i64: 16, 32>}, {transform_indices = @transform_1, window_bounds = array<i64: 16, 1>}, {transform_indices = @transform_2, window_bounds = array<i64: 16, 1>}]} {
    %c0 = arith.constant 0 : index
    %c0_0 = arith.constant 0 : index
    %0 = vector.load %arg1[%c0, %c0_0] : memref<16x32xf32, #tpu.memory_space<vmem>>, vector<16x32xf32>
    %cst = arith.constant dense<0xFF800000> : vector<16xf32>
    %1 = vector.multi_reduction <maximumf>, %0, %cst [1] : vector<16x32xf32> to vector<16xf32>
    %2 = vector.shape_cast %1 : vector<16xf32> to vector<16x1xf32>
    %3 = vector.broadcast %2 : vector<16x1xf32> to vector<16x32xf32>
    %4 = arith.subf %0, %3 : vector<16x32xf32>
    %5 = math.exp %4 : vector<16x32xf32>
    %cst_1 = arith.constant dense<0.000000e+00> : vector<16xf32>
    %6 = vector.multi_reduction <add>, %5, %cst_1 [1] : vector<16x32xf32> to vector<16xf32>
    %7 = vector.shape_cast %6 : vector<16xf32> to vector<16x1xf32>
    %8 = math.log %7 : vector<16x1xf32>
    %cst_2 = arith.constant dense<0.000000e+00> : vector<16xf32>
    %9 = vector.multi_reduction <add>, %4, %cst_2 [1] : vector<16x32xf32> to vector<16xf32>
    %10 = vector.shape_cast %9 : vector<16xf32> to vector<16x1xf32>
    %cst_3 = arith.constant 3.200000e+01 : f32
    %11 = vector.broadcast %cst_3 : f32 to vector<16x1xf32>
    %12 = arith.mulf %11, %8 : vector<16x1xf32>
    %13 = arith.subf %10, %12 : vector<16x1xf32>
    %14 = tpu.iota {dimensions = array<i32: 1>} : vector<16x32xi32>
    %c0_4 = arith.constant 0 : index
    %c0_5 = arith.constant 0 : index
    %15 = vector.load %arg2[%c0_4, %c0_5] : memref<16x1xi32, #tpu.memory_space<vmem>>, vector<16x1xi32>
    %16 = vector.broadcast %15 : vector<16x1xi32> to vector<16x32xi32>
    %17 = arith.cmpi eq, %14, %16 : vector<16x32xi32>
    %cst_6 = arith.constant 0.000000e+00 : f32
    %18 = vector.broadcast %cst_6 : f32 to vector<16x32xf32>
    %19 = arith.select %17, %4, %18 : vector<16x32xi1>, vector<16x32xf32>
    %cst_7 = arith.constant dense<0.000000e+00> : vector<16xf32>
    %20 = vector.multi_reduction <add>, %19, %cst_7 [1] : vector<16x32xf32> to vector<16xf32>
    %21 = vector.shape_cast %20 : vector<16xf32> to vector<16x1xf32>
    %22 = arith.subf %21, %8 : vector<16x1xf32>
    %cst_8 = arith.constant 0.0032258064 : f32
    %23 = vector.broadcast %cst_8 : f32 to vector<16x1xf32>
    %24 = arith.mulf %23, %13 : vector<16x1xf32>
    %cst_9 = arith.constant 0.896774172 : f32
    %25 = vector.broadcast %cst_9 : f32 to vector<16x1xf32>
    %26 = arith.mulf %25, %22 : vector<16x1xf32>
    %27 = arith.addf %24, %26 : vector<16x1xf32>
    %cst_10 = arith.constant 0.000000e+00 : f32
    %28 = vector.broadcast %cst_10 : f32 to vector<16x1xf32>
    %29 = arith.subf %28, %27 : vector<16x1xf32>
    %c16_i32 = arith.constant 16 : i32
    %30 = arith.muli %arg0, %c16_i32 : i32
    %31 = tpu.iota {dimensions = array<i32: 0>} : vector<16x1xi32>
    %32 = vector.broadcast %30 : i32 to vector<16x1xi32>
    %33 = arith.addi %32, %31 : vector<16x1xi32>
    %c16_i32_11 = arith.constant 16 : i32
    %34 = vector.broadcast %c16_i32_11 : i32 to vector<16x1xi32>
    %35 = arith.cmpi slt, %33, %34 : vector<16x1xi32>
    %cst_12 = arith.constant 0.000000e+00 : f32
    %36 = vector.broadcast %cst_12 : f32 to vector<16x1xf32>
    %37 = arith.select %35, %29, %36 : vector<16x1xi1>, vector<16x1xf32>
    %c0_13 = arith.constant 0 : index
    %c0_14 = arith.constant 0 : index
    %38 = vector.load %arg3[%c0_13, %c0_14] : memref<16x1xf32, #tpu.memory_space<vmem>>, vector<16x1xf32>
    tpu.vector_store %arg3[%c0_13, %c0_14], %37 {strides = array<i32>} : memref<16x1xf32, #tpu.memory_space<vmem>>, vector<16x1xf32>,
    return
  }
  func.func @transform_0(%arg0: i32) -> (i32, i32) {
    %c0_i32 = arith.constant 0 : i32
    %c0_i32_0 = arith.constant 0 : i32
    return %arg0, %c0_i32 : i32, i32
  }
  func.func @transform_1(%arg0: i32) -> (i32, i32) {
    %c0_i32 = arith.constant 0 : i32
    %c0_i32_0 = arith.constant 0 : i32
    return %arg0, %c0_i32 : i32, i32
  }
  func.func @transform_2(%arg0: i32) -> (i32, i32) {
    %c0_i32 = arith.constant 0 : i32
    %c0_i32_0 = arith.constant 0 : i32
    return %arg0, %c0_i32 : i32, i32
  }
}

</mosaic_0001>

<bundles_post_ra>
// kernel: tpu_custom_call.1
= control target key start
LH: loop header
LB: loop body
LE: loop exit
PB: predicated region body
PF: predicated region fallthrough
CT: control target
= control target key end

     0   :  { %vm13_vm0 = vcmask 261120   ;;  %v105_v2 = vmov 0   ;;  %v46_v13 = vlaneseq  ;;  %vm87_vm3 = vcmask 7168   ;;  %s147_s0 = inlined_call_operand.vmem [shape: f32[16,32], index: 0, kind: input, shape index: {}]   ;;  %s148_s1 = inlined_call_operand.vmem [shape: s32[16,1], index: 1, kind: input, shape index: {}]   ;;  %s149_s2 = inlined_call_operand.vmem [shape: f32[16,1], index: 2, kind: output, shape index: {}]  }
   0x1   :  { %v11_v0 = vld [vmem:[%s147_s0] sm:$0xff]  ;;  %v12_v1 = vld [vmem:[%s147_s0 + $0x8] sm:$0xff]  ;;  %95 = vset.pattern.permute.xlu1 %v105_v2  ;;  %96 = vset.pattern.permute.xlu0 %v105_v2 }
   0x2   :  { %v48_v3 = vld [vmem:[%s148_s1] sm:$0xff]  ;;  %v14_v4 = vsel %vm13_vm0, %v11_v0, -inf  ;;  %v49_v5 = vld [vmem:[%s148_s1 + $0x8] sm:$0xff]  ;;  %v17_v6 = vsel %vm13_vm0, %v12_v1, -inf  ;;  %v47_v17 = vand.u32 127, %v46_v13 }
   0x3   :  { %51 = vperm.xlu1 %95, %v48_v3   ;;  %15 = vmax.xlane.f32.xlu0 %v14_v4 }
   0x7   :  { %54 = vperm.xlu1 %95, %v49_v5   ;;  %18 = vmax.xlane.f32.xlu0 %v17_v6 }
  0x82   :  { %v52_v16 = vpop.permute.xlu1 %51 }
  0x83   :  { %vm56_vm1 = vcmp.eq.s32.totalorder %v47_v17, %v52_v16 }
  0x86   :  { %v55_v21 = vpop.permute.xlu1 %54 }
  0x87   :  { %vm57_vm2 = vcmp.eq.s32.totalorder %v47_v17, %v55_v21 }
  0x90   :  { %v16_v7 = vpop.xlane.xlu0 %15 }
  0x91   :  { %v20_v8 = vsub.f32 %v11_v0, %v16_v7 }
  0x93   :  { %v22_v9 = vmul.f32 1.442695, %v20_v8  ;;  %v36_v19 = vsel %vm13_vm0, %v20_v8, 0.0  ;;  %v58_v23 = vsel %vm56_vm1, %v20_v8, 0.0 }
  0x94   :  { %v19_v10 = vpop.xlane.xlu0 %18  ;;  %v60_v24 = vsel %vm13_vm0, %v58_v23, 0.0 }
  0x95   :  { %97 = vpow2.f32 %v22_v9  ;;  %v21_v11 = vsub.f32 %v12_v1, %v19_v10 }
  0x97   :  { %v24_v12 = vmul.f32 1.442695, %v21_v11  ;;  %v39_v22 = vsel %vm13_vm0, %v21_v11, 0.0  ;;  %v59_v25 = vsel %vm57_vm2, %v21_v11, 0.0 }
  0x98   :  { %v63_v26 = vsel %vm13_vm0, %v59_v25, 0.0 }
  0x99   :  { %99 = vpow2.f32 %v24_v12 }
  0x9f   :  { %v98_v14 = vpop.eup %97 }
  0xa0   :  { %v26_v15 = vsel %vm13_vm0, %v98_v14, 0.0 }
  0xa1   :  { %27 = vadd.xlane.f32.xlu0 %v26_v15 }
  0xa3   :  { %v100_v18 = vpop.eup %99 }
  0xa4   :  { %v29_v20 = vsel %vm13_vm0, %v100_v18, 0.0 }
  0xa5   :  { %37 = vadd.xlane.f32.xlu0 %v36_v19  ;;  %30 = vadd.xlane.f32.xlu1 %v29_v20 }
  0xa9   :  { %40 = vadd.xlane.f32.xlu0 %v39_v22 }
  0xad   :  { %61 = vadd.xlane.f32.xlu0 %v60_v24 }
  0xb1   :  { %64 = vadd.xlane.f32.xlu0 %v63_v26 }
 0x12e   :  { %v28_v27 = vpop.xlane.xlu0 %27 }
 0x12f   :  { %101 = vlog2.f32 %v28_v27 }
 0x132   :  { %v31_v28 = vpop.xlane.xlu1 %30  ;;  %v38_v29 = vpop.xlane.xlu0 %37 }
 0x133   :  { %103 = vlog2.f32 %v31_v28 }
 0x136   :  { %v41_v30 = vpop.xlane.xlu0 %40 }
 0x139   :  { %v102_v31 = vpop.eup %101 }
 0x13a   :  { %v33_v32 = vmul.f32 0.6931472, %v102_v31  ;;  %v62_v33 = vpop.xlane.xlu0 %61 }
 0x13c   :  { %v42_v34 = vmul.f32 32.0, %v33_v32  ;;  %v66_v35 = vsub.f32 %v62_v33, %v33_v32 }
 0x13d   :  { %v104_v36 = vpop.eup %103 }
 0x13e   :  { %v35_v37 = vmul.f32 0.6931472, %v104_v36  ;;  %v44_v38 = vsub.f32 %v38_v29, %v42_v34  ;;  %v65_v39 = vpop.xlane.xlu0 %64  ;;  %v70_v42 = vmul.f32 0.8967742, %v66_v35 }
 0x140   :  { %v68_v40 = vmul.f32 0.0032258064, %v44_v38  ;;  %v43_v41 = vmul.f32 32.0, %v35_v37  ;;  %v67_v43 = vsub.f32 %v65_v39, %v35_v37 }
 0x142   :  { %v45_v44 = vsub.f32 %v41_v30, %v43_v41  ;;  %v72_v45 = vadd.f32 %v70_v42, %v68_v40  ;;  %v71_v48 = vmul.f32 0.8967742, %v67_v43 }
 0x144   :  { %v69_v46 = vmul.f32 0.0032258064, %v45_v44  ;;  %v74_v47 = vsub.f32 0.0, %v72_v45 }
 0x146   :  { %88 = vst.msk [vmem:[%s149_s2] sm:$0xff] %vm87_vm3, %v74_v47  ;;  %v73_v49 = vadd.f32 %v71_v48, %v69_v46 }
 0x148   :  { %v75_v50 = vsub.f32 0.0, %v73_v49 }
 0x14a   :  { %89 = vst.msk [vmem:[%s149_s2 + $0x8] sm:$0xff] %vm87_vm3, %v75_v50 }

</bundles_post_ra>
